<compile_context>
chip_gen: v6e
topology: v6e:2x2x1
jax: 0.10.0
libtpu: 0.0.40
codegen_flags: <defaults>
</compile_context>

<pallas_src>
import jax
import jax.numpy as jnp
from jax.experimental import pallas as pl
from jax.experimental.pallas import tpu as pltpu

D_IN = 64   # input feature width (mi_emb / di_emb)
H1 = 32     # linear1 out (folded away)
H2 = 16     # linear2 out (= pair_feat3 width)
H3 = 1      # linear3 out
BIG_TILE_N = 1024  # rows per grid step for non-toy N


# ----------------------------------------------------------------------------
# Fused kernel: one row-tile per grid step; everything lives in VMEM/vregs.
#   x      = mi * di                       (T, 64)   VPU
#   feat3  = x @ W12 + b12                 (T, 16)   MXU
#   logit  = sum(x * Wall_row, -1) + ball  (T, 1)    VPU + XLU reduce
#   prob   = sigmoid(logit)                (T, 1)    EUP
# ----------------------------------------------------------------------------
def _mlp_kernel(mi_ref, di_ref, w12_ref, b12_ref, wall_ref, ball_ref,
                feat3_ref, prob_ref):
    x = mi_ref[...] * di_ref[...]                                     # (T, 64)
    feat3 = jnp.dot(x, w12_ref[...],
                    preferred_element_type=jnp.float32) + b12_ref[...]  # (T, 16)
    logit = jnp.sum(x * wall_ref[...], axis=-1, keepdims=True) + ball_ref[...]  # (T, 1)
    feat3_ref[...] = feat3
    prob_ref[...] = jax.nn.sigmoid(logit)


def mlp_forward(mi_emb, di_emb, m, d, params):
    # m, d are unused by the reference forward; kept for signature parity.
    del m, d
    n, d_in = mi_emb.shape
    assert d_in == D_IN

    # Tile selection (see header): single step for small N, 1024-row tiles with
    # an even step count otherwise (v7x megacore balance).
    if n <= BIG_TILE_N:
        tile_n = max(8, ((n + 7) // 8) * 8)   # one step, sublane-aligned
        num_tiles = 1
    else:
        tile_n = BIG_TILE_N
        num_tiles = (n + tile_n - 1) // tile_n
        if num_tiles % 2:
            num_tiles += 1                    # even split across 2 TCs on v7x
    n_pad = num_tiles * tile_n

    if n_pad != n:
        pad = ((0, n_pad - n), (0, 0))
        mi_emb = jnp.pad(mi_emb, pad)
        di_emb = jnp.pad(di_emb, pad)

    row_spec = pl.BlockSpec((tile_n, D_IN), lambda i: (i, 0))

    def full(shape):
        return pl.BlockSpec(shape, lambda i: (0, 0))

    feat3, prob = pl.pallas_call(
        _mlp_kernel,
        out_shape=(
            jax.ShapeDtypeStruct((n_pad, H2), jnp.float32),   # pair_feat3
            jax.ShapeDtypeStruct((n_pad, H3), jnp.float32),   # sigmoid(pair_feat4)
        ),
        grid=(num_tiles,),
        in_specs=[
            row_spec,             # mi_emb  (N, 64)
            row_spec,             # di_emb  (N, 64)
            full((D_IN, H2)),     # W12     (64, 16)
            full((1, H2)),        # b12     (1, 16)
            full((1, D_IN)),      # Wall    (1, 64)   (row vector for reduce)
            full((1, H3)),        # ball    (1, 1)
        ],
        out_specs=(
            pl.BlockSpec((tile_n, H2), lambda i: (i, 0)),
            pl.BlockSpec((tile_n, H3), lambda i: (i, 0)),
        ),
        compiler_params=pltpu.CompilerParams(
            dimension_semantics=("parallel",)),
    )(mi_emb, di_emb,
      params["w12"], params["b12"], params["wall"], params["ball"])

    if n_pad != n:
        # Padded tail rows hold sigmoid(ball)/b12 garbage -> drop them here.
        feat3 = feat3[:n]
        prob = prob[:n]
    return prob, feat3


# ----------------------------------------------------------------------------
# Parameter folding: the three linears have no activation between them, so
#   pair_feat3 = x @ (w1.T @ w2.T) + (b1 @ w2.T + b2)        = x @ W12 + b12
#   pair_feat4 = x @ (W12 @ w3.T)  + (b12 @ w3.T + b3)       = x @ Wall + ball
# (f32 refactoring; agrees with the layer-by-layer reference to ~1e-6.)
# ----------------------------------------------------------------------------
def pack_params(w1, b1, w2, b2, w3, b3):
    w12 = w1.T @ w2.T                       # (64, 16)
    b12 = b1 @ w2.T + b2                    # (16,)
    wall = w12 @ w3.T                       # (64, 1)
    ball = b12 @ w3.T + b3                  # (1,)
    return {
        "w12": w12.astype(jnp.float32),
        "b12": b12.reshape(1, H2).astype(jnp.float32),
        "wall": wall.reshape(1, D_IN).astype(jnp.float32),   # row vector
        "ball": ball.reshape(1, H3).astype(jnp.float32),
    }


if __name__ == "__main__":
    N = 256  # number of (miRNA, disease) pairs

    key = jax.random.PRNGKey(0)
    ks = jax.random.split(key, 8)

    mi_emb = jax.random.normal(ks[0], (N, D_IN), jnp.float32)
    di_emb = jax.random.normal(ks[1], (N, D_IN), jnp.float32)
    # Pair index vectors: present in the PyTorch signature but unused by it.
    m = jnp.arange(N, dtype=jnp.int32)
    d = jnp.arange(N, dtype=jnp.int32)

    def linear_init(k, out_f, in_f):
        # torch nn.Linear-style uniform(-1/sqrt(in), 1/sqrt(in)) init.
        k1, k2 = jax.random.split(k)
        bound = 1.0 / (in_f ** 0.5)
        w = jax.random.uniform(k1, (out_f, in_f), jnp.float32, -bound, bound)
        b = jax.random.uniform(k2, (out_f,), jnp.float32, -bound, bound)
        return w, b

    w1, b1 = linear_init(ks[2], H1, D_IN)
    w2, b2 = linear_init(ks[3], H2, H1)
    w3, b3 = linear_init(ks[4], H3, H2)
    params = pack_params(w1, b1, w2, b2, w3, b3)

    prob, feat3 = mlp_forward(mi_emb, di_emb, m, d, params)
    jax.block_until_ready((prob, feat3))

    # Pure-JAX layer-by-layer reference (matches the PyTorch forward).
    x = mi_emb * di_emb
    r1 = x @ w1.T + b1
    r2 = r1 @ w2.T + b2
    r3 = r2 @ w3.T + b3
    ref_prob = jax.nn.sigmoid(r3)

    assert prob.shape == (N, H3) and feat3.shape == (N, H2)
    assert jnp.all(jnp.isfinite(prob)) and jnp.all(jnp.isfinite(feat3))
    assert jnp.allclose(feat3, r2, atol=1e-5, rtol=1e-5)
    assert jnp.allclose(prob, ref_prob, atol=1e-5, rtol=1e-5)
    print("KERNEL_OK")
</pallas_src>

<mosaic_0001>
module attributes {stable_mosaic.version = 11 : i64} {
  func.func @_mlp_kernel(%arg0: i32, %arg1: memref<256x64xf32, #tpu.memory_space<vmem>>, %arg2: memref<256x64xf32, #tpu.memory_space<vmem>>, %arg3: memref<64x16xf32, #tpu.memory_space<vmem>>, %arg4: memref<1x16xf32, #tpu.memory_space<vmem>>, %arg5: memref<1x64xf32, #tpu.memory_space<vmem>>, %arg6: memref<1x1xf32, #tpu.memory_space<vmem>>, %arg7: memref<256x16xf32, #tpu.memory_space<vmem>>, %arg8: memref<256x1xf32, #tpu.memory_space<vmem>>) attributes {dimension_semantics = [#tpu.dimension_semantics<parallel>], iteration_bounds = array<i64: 1>, scalar_prefetch = 0 : i64, scratch_operands = 0 : i64, tpu.core_type = #tpu.core_type<tc>, window_params = [{transform_indices = @transform_0, window_bounds = array<i64: 256, 64>}, {transform_indices = @transform_1, window_bounds = array<i64: 256, 64>}, {pipeline_mode = #tpu.pipeline_mode<synchronous>, transform_indices = @transform_2, window_bounds = array<i64: 64, 16>}, {pipeline_mode = #tpu.pipeline_mode<synchronous>, transform_indices = @transform_3, window_bounds = array<i64: 1, 16>}, {pipeline_mode = #tpu.pipeline_mode<synchronous>, transform_indices = @transform_4, window_bounds = array<i64: 1, 64>}, {pipeline_mode = #tpu.pipeline_mode<synchronous>, transform_indices = @transform_5, window_bounds = array<i64: 1, 1>}, {transform_indices = @transform_6, window_bounds = array<i64: 256, 16>}, {transform_indices = @transform_7, window_bounds = array<i64: 256, 1>}]} {
    %c0 = arith.constant 0 : index
    %c0_0 = arith.constant 0 : index
    %0 = vector.load %arg1[%c0, %c0_0] : memref<256x64xf32, #tpu.memory_space<vmem>>, vector<256x64xf32>
    %c0_1 = arith.constant 0 : index
    %c0_2 = arith.constant 0 : index
    %1 = vector.load %arg2[%c0_1, %c0_2] : memref<256x64xf32, #tpu.memory_space<vmem>>, vector<256x64xf32>
    %2 = arith.mulf %0, %1 : vector<256x64xf32>
    %c0_3 = arith.constant 0 : index
    %c0_4 = arith.constant 0 : index
    %3 = vector.load %arg3[%c0_3, %c0_4] : memref<64x16xf32, #tpu.memory_space<vmem>>, vector<64x16xf32>
    %cst = arith.constant dense<0.000000e+00> : vector<256x16xf32>
    %4 = tpu.matmul %2, %3, %cst {dimension_numbers = #tpu.dot_dimension_numbers<[1], [0], [0], [1], [0, 0, 1, 1], [], []>} : vector<256x64xf32>, vector<64x16xf32>, vector<256x16xf32> -> vector<256x16xf32>
    %c0_5 = arith.constant 0 : index
    %c0_6 = arith.constant 0 : index
    %5 = vector.load %arg4[%c0_5, %c0_6] : memref<1x16xf32, #tpu.memory_space<vmem>>, vector<1x16xf32>
    %6 = vector.broadcast %5 : vector<1x16xf32> to vector<256x16xf32>
    %7 = arith.addf %4, %6 : vector<256x16xf32>
    %c0_7 = arith.constant 0 : index
    %c0_8 = arith.constant 0 : index
    %8 = vector.load %arg5[%c0_7, %c0_8] : memref<1x64xf32, #tpu.memory_space<vmem>>, vector<1x64xf32>
    %9 = vector.broadcast %8 : vector<1x64xf32> to vector<256x64xf32>
    %10 = arith.mulf %2, %9 : vector<256x64xf32>
    %cst_9 = arith.constant dense<0.000000e+00> : vector<256xf32>
    %11 = vector.multi_reduction <add>, %10, %cst_9 [1] : vector<256x64xf32> to vector<256xf32>
    %12 = vector.shape_cast %11 : vector<256xf32> to vector<256x1xf32>
    %c0_10 = arith.constant 0 : index
    %c0_11 = arith.constant 0 : index
    %13 = vector.load %arg6[%c0_10, %c0_11] : memref<1x1xf32, #tpu.memory_space<vmem>>, vector<1x1xf32>
    %14 = vector.broadcast %13 : vector<1x1xf32> to vector<256x1xf32>
    %15 = arith.addf %12, %14 : vector<256x1xf32>
    %c0_12 = arith.constant 0 : index
    %c0_13 = arith.constant 0 : index
    %16 = vector.load %arg7[%c0_12, %c0_13] : memref<256x16xf32, #tpu.memory_space<vmem>>, vector<256x16xf32>
    tpu.vector_store %arg7[%c0_12, %c0_13], %7 {strides = array<i32>} : memref<256x16xf32, #tpu.memory_space<vmem>>, vector<256x16xf32>,
    %17 = arith.negf %15 : vector<256x1xf32>
    %18 = math.exp %17 : vector<256x1xf32>
    %cst_14 = arith.constant 1.000000e+00 : f32
    %19 = vector.broadcast %cst_14 : f32 to vector<256x1xf32>
    %20 = arith.addf %19, %18 : vector<256x1xf32>
    %21 = arith.divf %19, %20 : vector<256x1xf32>
    %c0_15 = arith.constant 0 : index
    %c0_16 = arith.constant 0 : index
    %22 = vector.load %arg8[%c0_15, %c0_16] : memref<256x1xf32, #tpu.memory_space<vmem>>, vector<256x1xf32>
    tpu.vector_store %arg8[%c0_15, %c0_16], %21 {strides = array<i32>} : memref<256x1xf32, #tpu.memory_space<vmem>>, vector<256x1xf32>,
    return
  }
  func.func @transform_0(%arg0: i32) -> (i32, i32) {
    %c0_i32 = arith.constant 0 : i32
    %c0_i32_0 = arith.constant 0 : i32
    return %arg0, %c0_i32 : i32, i32
  }
  func.func @transform_1(%arg0: i32) -> (i32, i32) {
    %c0_i32 = arith.constant 0 : i32
    %c0_i32_0 = arith.constant 0 : i32
    return %arg0, %c0_i32 : i32, i32
  }
  func.func @transform_2(%arg0: i32) -> (i32, i32) {
    %c0_i32 = arith.constant 0 : i32
    %c0_i32_0 = arith.constant 0 : i32
    %c0_i32_1 = arith.constant 0 : i32
    return %c0_i32, %c0_i32_0 : i32, i32
  }
  func.func @transform_3(%arg0: i32) -> (i32, i32) {
    %c0_i32 = arith.constant 0 : i32
    %c0_i32_0 = arith.constant 0 : i32
    %c0_i32_1 = arith.constant 0 : i32
    return %c0_i32, %c0_i32_0 : i32, i32
  }
  func.func @transform_4(%arg0: i32) -> (i32, i32) {
    %c0_i32 = arith.constant 0 : i32
    %c0_i32_0 = arith.constant 0 : i32
    %c0_i32_1 = arith.constant 0 : i32
    return %c0_i32, %c0_i32_0 : i32, i32
  }
  func.func @transform_5(%arg0: i32) -> (i32, i32) {
    %c0_i32 = arith.constant 0 : i32
    %c0_i32_0 = arith.constant 0 : i32
    %c0_i32_1 = arith.constant 0 : i32
    return %c0_i32, %c0_i32_0 : i32, i32
  }
  func.func @transform_6(%arg0: i32) -> (i32, i32) {
    %c0_i32 = arith.constant 0 : i32
    %c0_i32_0 = arith.constant 0 : i32
    return %arg0, %c0_i32 : i32, i32
  }
  func.func @transform_7(%arg0: i32) -> (i32, i32) {
    %c0_i32 = arith.constant 0 : i32
    %c0_i32_0 = arith.constant 0 : i32
    return %arg0, %c0_i32 : i32, i32
  }
}

</mosaic_0001>

<bundles_post_ra>
// kernel: tpu_custom_call.1
= control target key start
LH: loop header
LB: loop body
LE: loop exit
PB: predicated region body
PF: predicated region fallthrough
CT: control target
= control target key end

     0   :  { %vm138_vm0 = vcmask 523264   ;;  %vm859_vm1 = vcmask 7168   ;;  %vm634_vm2 = vcmask 130048   ;;  %s2002_s2 = inlined_call_operand.vmem [shape: f32[64,16], index: 2, kind: input, shape index: {}]   ;;  %s2003_s0 = inlined_call_operand.vmem [shape: f32[256,64], index: 0, kind: input, shape index: {}]   ;;  %s2004_s1 = inlined_call_operand.vmem [shape: f32[256,64], index: 1, kind: input, shape index: {}]   ;;  %s2005_s4 = inlined_call_operand.vmem [shape: f32[1,64], index: 4, kind: input, shape index: {}]   ;;  %s2006_s5 = inlined_call_operand.<no memory space> [shape: f32[1,1], index: 5, kind: input, shape index: {}]   ;;  %s2007_s7 = inlined_call_operand.vmem [shape: f32[256,1], index: 7, kind: output, shape index: {1}]   ;;  %s2008_s3 = inlined_call_operand.vmem [shape: f32[1,16], index: 3, kind: input, shape index: {}]   ;;  %s2009_s6 = inlined_call_operand.vmem [shape: f32[256,16], index: 6, kind: output, shape index: {0}]  }
   0x1   :  { %v130_v0 = vld [vmem:[%s2002_s2 + $0x38] sm:$0xff]  ;;  %v129_v1 = vld [vmem:[%s2002_s2 + $0x30] sm:$0xff]  ;;  %v13_v2 = vstv %s2006_s5  ;;  %v128_v3 = vld [vmem:[%s2002_s2 + $0x28] sm:$0xff] }
   0x2   :  { %1007 = vmatprep.subr.mxu0 %v130_v0  ;;  %1071 = vmatprep.subr.mxu1 %v130_v0  ;;  %v29_v4 = vld [vmem:[%s2003_s0 + $0x10] sm:$0xff]  ;;  %14 = vst [vmem:[#allocation2] sm:$0x1] %v13_v2  ;;  %v1276_v6 = vld [vmem:[%s2005_s4] ss:$0 sm:$0xff]  ;;  %v30_v12 = vld [vmem:[%s2003_s0 + $0x18] sm:$0xff] }
   0x3   :  { %1008 = vmatpush3.msra.mxu0 %v130_v0  ;;  %1079 = vmatpush3.msra.mxu1 %v130_v0  ;;  %v61_v5 = vld [vmem:[%s2004_s1 + $0x10] sm:$0xff]  ;;  %v27_v7 = vld [vmem:[%s2003_s0] sm:$0xff]  ;;  %v62_v13 = vld [vmem:[%s2004_s1 + $0x18] sm:$0xff] }
   0x4   :  { %1009 = vmatprep.subr.mxu0 %v129_v1  ;;  %1072 = vmatprep.subr.mxu1 %v129_v1  ;;  %v127_v8 = vld [vmem:[%s2002_s2 + $0x20] sm:$0xff]  ;;  %v1284_v9 = vmul.f32 %v61_v5, %v29_v4  ;;  %v28_v14 = vld [vmem:[%s2003_s0 + $0x8] sm:$0xff]  ;;  %v1302_v16 = vmul.f32 %v62_v13, %v30_v12  ;;  %v126_v18 = vld [vmem:[%s2002_s2 + $0x18] sm:$0xff] }
   0x5   :  { %v59_v10 = vld [vmem:[%s2004_s1] sm:$0xff]  ;;  %1010 = vmatpush3.msra.mxu0 %v129_v1  ;;  %1080 = vmatpush3.msra.mxu1 %v129_v1  ;;  %v60_v17 = vld [vmem:[%s2004_s1 + $0x8] sm:$0xff]  ;;  %v125_v27 = vld [vmem:[%s2002_s2 + $0x10] sm:$0xff] }
   0x6   :  { %v1289_v11 = vmul.f32 %v59_v10, %v27_v7  ;;  %1011 = vmatprep.subr.mxu0 %v128_v3  ;;  %1073 = vmatprep.subr.mxu1 %v128_v3  ;;  %v469_v15 = vmul.f32 %v1276_v6, %v1284_v9  ;;  %v1312_v20 = vmul.f32 %v60_v17, %v28_v14  ;;  %v32_v21 = vld [vmem:[%s2003_s0 + $0x28] sm:$0xff]  ;;  %v31_v23 = vld [vmem:[%s2003_s0 + $0x20] sm:$0xff]  ;;  %v34_v32 = vld [vmem:[%s2003_s0 + $0x38] sm:$0xff] }
   0x7   :  { %1012 = vmatpush3.msra.mxu0 %v128_v3  ;;  %1081 = vmatpush3.msra.mxu1 %v128_v3  ;;  %v64_v22 = vld [vmem:[%s2004_s1 + $0x28] sm:$0xff]  ;;  %v63_v26 = vld [vmem:[%s2004_s1 + $0x20] sm:$0xff]  ;;  %v470_v28 = vmul.f32 %v1276_v6, %v1302_v16  ;;  %v66_v33 = vld [vmem:[%s2004_s1 + $0x38] sm:$0xff] }
   0x8   :  { %v467_v19 = vmul.f32 %v1276_v6, %v1289_v11  ;;  %1013 = vmatprep.subr.mxu0 %v127_v8  ;;  %1074 = vmatprep.subr.mxu1 %v127_v8  ;;  %v505_v24 = vsel %vm138_vm0, %v469_v15, 0.0  ;;  %v468_v29 = vmul.f32 %v1276_v6, %v1312_v20  ;;  %v1335_v30 = vmul.f32 %v64_v22, %v32_v21  ;;  %v124_v34 = vld [vmem:[%s2002_s2 + $0x8] sm:$0xff]  ;;  %v33_v35 = vld [vmem:[%s2003_s0 + $0x30] sm:$0xff]  ;;  %v43_v37 = vld [vmem:[%s2003_s0 + $0x80] sm:$0xff] }
   0x9   :  { %1014 = vmatpush3.msra.mxu0 %v127_v8  ;;  %1082 = vmatpush3.msra.mxu1 %v127_v8  ;;  %v1337_v31 = vmul.f32 %v63_v26, %v31_v23  ;;  %v65_v36 = vld [vmem:[%s2004_s1 + $0x30] sm:$0xff]  ;;  %v75_v38 = vld [vmem:[%s2004_s1 + $0x80] sm:$0xff]  ;;  %v508_v39 = vsel %vm138_vm0, %v470_v28, 0.0  ;;  %v44_v42 = vld [vmem:[%s2003_s0 + $0x88] sm:$0xff]  ;;  %v1373_v45 = vmul.f32 %v66_v33, %v34_v32 }
   0xa   :  { %v499_v25 = vsel %vm138_vm0, %v467_v19, 0.0  ;;  %1015 = vmatprep.subr.mxu0 %v126_v18  ;;  %1075 = vmatprep.subr.mxu1 %v126_v18  ;;  %v502_v40 = vsel %vm138_vm0, %v468_v29, 0.0  ;;  %v123_v41 = vld [vmem:[%s2002_s2] sm:$0xff]  ;;  %v76_v43 = vld [vmem:[%s2004_s1 + $0x88] sm:$0xff]  ;;  %v472_v44 = vmul.f32 %v1276_v6, %v1335_v30  ;;  %v45_v47 = vld [vmem:[%s2003_s0 + $0x90] sm:$0xff]  ;;  %v1383_v49 = vmul.f32 %v65_v36, %v33_v35 }
   0xb   :  { %1016 = vmatpush3.msra.mxu0 %v126_v18  ;;  %1083 = vmatpush3.msra.mxu1 %v126_v18  ;;  %v471_v46 = vmul.f32 %v1276_v6, %v1337_v31  ;;  %v77_v48 = vld [vmem:[%s2004_s1 + $0x90] sm:$0xff]  ;;  %v36_v50 = vld [vmem:[%s2003_s0 + $0x48] sm:$0xff]  ;;  %v1388_v51 = vmul.f32 %v75_v38, %v43_v37  ;;  %v35_v53 = vld [vmem:[%s2003_s0 + $0x40] sm:$0xff]  ;;  %v1399_v55 = vmul.f32 %v76_v43, %v44_v42 }
   0xc   :  { %506 = vadd.xlane.f32.xlu1 %v505_v24  ;;  %500 = vadd.xlane.f32.xlu0 %v499_v25  ;;  %v68_v52 = vld [vmem:[%s2004_s1 + $0x48] sm:$0xff]  ;;  %v67_v54 = vld [vmem:[%s2004_s1 + $0x40] sm:$0xff]  ;;  %v514_v56 = vsel %vm138_vm0, %v472_v44, 0.0  ;;  %v1402_v57 = vmul.f32 %v77_v48, %v45_v47  ;;  %v46_v58 = vld [vmem:[%s2003_s0 + $0x98] sm:$0xff]  ;;  %v474_v60 = vmul.f32 %v1276_v6, %v1373_v45  ;;  %v473_v63 = vmul.f32 %v1276_v6, %v1383_v49 }
   0xd   :  { %1017 = vmatprep.subr.mxu0 %v125_v27  ;;  %1076 = vmatprep.subr.mxu1 %v125_v27  ;;  %v78_v59 = vld [vmem:[%s2004_s1 + $0x98] sm:$0xff]  ;;  %v47_v61 = vld [vmem:[%s2003_s0 + $0xa0] sm:$0xff]  ;;  %v511_v62 = vsel %vm138_vm0, %v471_v46, 0.0  ;;  %v1421_v1 = vmul.f32 %v68_v52, %v36_v50  ;;  %v1423_v2 = vmul.f32 %v67_v54, %v35_v53  ;;  %v37_v5 = vld [vmem:[%s2003_s0 + $0x50] sm:$0xff] }
   0xe   :  { %1018 = vmatpush3.msra.mxu0 %v125_v27  ;;  %1084 = vmatpush3.msra.mxu1 %v125_v27  ;;  %v79_v0 = vld [vmem:[%s2004_s1 + $0xa0] sm:$0xff]  ;;  %v38_v3 = vld [vmem:[%s2003_s0 + $0x58] sm:$0xff]  ;;  %v69_v7 = vld [vmem:[%s2004_s1 + $0x50] sm:$0xff]  ;;  %v1445_v8 = vmul.f32 %v78_v59, %v46_v58  ;;  %v520_v10 = vsel %vm138_vm0, %v474_v60, 0.0  ;;  %v517_v17 = vsel %vm138_vm0, %v473_v63, 0.0 }
   0xf   :  { %1019 = vmatprep.subr.mxu0 %v124_v34  ;;  %1077 = vmatprep.subr.mxu1 %v124_v34  ;;  %v70_v4 = vld [vmem:[%s2004_s1 + $0x58] sm:$0xff]  ;;  %v48_v12 = vld [vmem:[%s2003_s0 + $0xa8] sm:$0xff]  ;;  %v49_v14 = vld [vmem:[%s2003_s0 + $0xb0] sm:$0xff]  ;;  %v476_v18 = vmul.f32 %v1276_v6, %v1421_v1  ;;  %v475_v19 = vmul.f32 %v1276_v6, %v1423_v2  ;;  %v1473_v21 = vmul.f32 %v69_v7, %v37_v5 }
  0x10   :  { %1020 = vmatpush3.msra.mxu0 %v124_v34  ;;  %1085 = vmatpush3.msra.mxu1 %v124_v34  ;;  %v80_v13 = vld [vmem:[%s2004_s1 + $0xa8] sm:$0xff]  ;;  %v1459_v15 = vmul.f32 %v70_v4, %v38_v3  ;;  %v39_v23 = vld [vmem:[%s2003_s0 + $0x60] sm:$0xff]  ;;  %v50_v27 = vld [vmem:[%s2003_s0 + $0xb8] sm:$0xff]  ;;  %v484_v5 = vmul.f32 %v1276_v6, %v1399_v55 }
  0x11   :  { %509 = vadd.xlane.f32.xlu1 %v508_v39  ;;  %503 = vadd.xlane.f32.xlu0 %v502_v40  ;;  %v72_v22 = vld [vmem:[%s2004_s1 + $0x68] sm:$0xff]  ;;  %v71_v24 = vld [vmem:[%s2004_s1 + $0x60] sm:$0xff]  ;;  %v1491_v25 = vmul.f32 %v80_v13, %v48_v12  ;;  %v82_v28 = vld [vmem:[%s2004_s1 + $0xb8] sm:$0xff]  ;;  %v526_v32 = vsel %vm138_vm0, %v476_v18, 0.0  ;;  %v523_v33 = vsel %vm138_vm0, %v475_v19, 0.0  ;;  %v477_v34 = vmul.f32 %v1276_v6, %v1473_v21 }
  0x12   :  { %1021 = vmatprep.subr.mxu0 %v123_v41  ;;  %1078 = vmatprep.subr.mxu1 %v123_v41  ;;  %v51_v35 = vld [vmem:[%s2003_s0 + $0xc0] sm:$0xff]  ;;  %v1519_v37 = vmul.f32 %v71_v24, %v39_v23  ;;  %v74_v38 = vld [vmem:[%s2004_s1 + $0x78] sm:$0xff]  ;;  %v41_v39 = vld [vmem:[%s2003_s0 + $0x70] sm:$0xff]  ;;  %v483_v12 = vmul.f32 %v1276_v6, %v1388_v51 }
  0x13   :  { %1022 = vmatpush3.msra.mxu0 %v123_v41  ;;  %1086 = vmatpush3.msra.mxu1 %v123_v41  ;;  %v83_v36 = vld [vmem:[%s2004_s1 + $0xc0] sm:$0xff]  ;;  %v73_v40 = vld [vmem:[%s2004_s1 + $0x70] sm:$0xff]  ;;  %v1537_v41 = vmul.f32 %v82_v28, %v50_v27  ;;  %v52_v44 = vld [vmem:[%s2003_s0 + $0xc8] sm:$0xff]  ;;  %v529_v47 = vsel %vm138_vm0, %v477_v34, 0.0 }
  0x14   :  { %1023 = vmatprep.mubr.msk.f32.mxu0 %vm138_vm0, %v1289_v11  ;;  %1047 = vmatprep.mubr.msk.f32.mxu1 %vm138_vm0, %v1388_v51  ;;  %v1448_v11 = vmul.f32 %v79_v0, %v47_v61  ;;  %v1540_v43 = vmul.f32 %v83_v36, %v51_v35  ;;  %v84_v46 = vld [vmem:[%s2004_s1 + $0xc8] sm:$0xff]  ;;  %v479_v48 = vmul.f32 %v1276_v6, %v1519_v37  ;;  %v53_v50 = vld [vmem:[%s2003_s0 + $0xd0] sm:$0xff]  ;;  %v54_v58 = vld [vmem:[%s2003_s0 + $0xd8] sm:$0xff] }
  0x15   :  { %1024 = vmatmul.mubr.msk.f32.vlgmr.msra.gmra.mxu0 %vm138_vm0, %v1312_v20  ;;  %1048 = vmatmul.mubr.msk.f32.vlgmr.msra.gmra.mxu1 %vm138_vm0, %v1399_v55  ;;  %v81_v20 = vld [vmem:[%s2004_s1 + $0xb0] sm:$0xff]  ;;  %v105_v54 = vmul.f32 %v73_v40, %v41_v39  ;;  %v86_v59 = vld [vmem:[%s2004_s1 + $0xd8] sm:$0xff]  ;;  %v55_v63 = vld [vmem:[%s2003_s0 + $0xe0] sm:$0xff]  ;;  %v490_v28 = vmul.f32 %v1276_v6, %v1537_v41 }
  0x16   :  { %515 = vadd.xlane.f32.xlu1 %v514_v56  ;;  %512 = vadd.xlane.f32.xlu0 %v511_v62  ;;  %v1493_v26 = vmul.f32 %v81_v20, %v49_v14  ;;  %v85_v52 = vld [vmem:[%s2004_s1 + $0xd0] sm:$0xff]  ;;  %v535_v60 = vsel %vm138_vm0, %v479_v48, 0.0  ;;  %v87_v0 = vld [vmem:[%s2004_s1 + $0xe0] sm:$0xff]  ;;  %v56_v3 = vld [vmem:[%s2003_s0 + $0xe8] sm:$0xff]  ;;  %v486_v20 = vmul.f32 %v1276_v6, %v1445_v8 }
  0x17   :  { %1026 = vmatprep.mubr.msk.f32.mxu0 %vm138_vm0, %v1284_v9  ;;  %1050 = vmatprep.mubr.msk.f32.mxu1 %vm138_vm0, %v1402_v57  ;;  %v40_v9 = vld [vmem:[%s2003_s0 + $0x68] sm:$0xff]  ;;  %v1569_v56 = vmul.f32 %v85_v52, %v53_v50  ;;  %v481_v62 = vmul.f32 %v1276_v6, %v105_v54  ;;  %v57_v13 = vld [vmem:[%s2003_s0 + $0xf0] sm:$0xff]  ;;  %v58_v51 = vld [vmem:[%s2003_s0 + $0xf8] sm:$0xff] }
  0x18   :  { %v1503_v29 = vmul.f32 %v72_v22, %v40_v9  ;;  %v88_v4 = vld [vmem:[%s2004_s1 + $0xe8] sm:$0xff]  ;;  %v89_v55 = vld [vmem:[%s2004_s1 + $0xf0] sm:$0xff]  ;;  %v90_v18 = vld [vmem:[%s2004_s1 + $0xf8] sm:$0xff]  ;;  %v556_v22 = vsel %vm138_vm0, %v486_v20, 0.0 }
  0x19   :  { %1027 = vmatmul.mubr.msk.f32.gmra.mxu0 %vm138_vm0, %v1302_v16  ;;  %1051 = vmatmul.mubr.msk.f32.gmra.mxu1 %vm138_vm0, %v1445_v8  ;;  %v478_v16 = vmul.f32 %v1276_v6, %v1459_v15  ;;  %v541_v7 = vsel %vm138_vm0, %v481_v62, 0.0  ;;  %v120_v14 = vmul.f32 %v88_v4, %v56_v3  ;;  %v121_v19 = vmul.f32 %v89_v55, %v57_v13 }
  0x1a   :  { %521 = vadd.xlane.f32.xlu1 %v520_v10  ;;  %518 = vadd.xlane.f32.xlu0 %v517_v17  ;;  %v119_v10 = vmul.f32 %v87_v0, %v55_v63  ;;  %v550_v17 = vsel %vm138_vm0, %v484_v5, 0.0  ;;  %v122_v9 = vmul.f32 %v90_v18, %v58_v51  ;;  %v488_v8 = vmul.f32 %v1276_v6, %v1491_v25 }
  0x1b   :  { %1029 = vmatprep.mubr.msk.f32.mxu0 %vm138_vm0, %v1337_v31  ;;  %1053 = vmatprep.mubr.msk.f32.mxu1 %vm138_vm0, %v1448_v11  ;;  %v42_v31 = vld [vmem:[%s2003_s0 + $0x78] sm:$0xff]  ;;  %v532_v42 = vsel %vm138_vm0, %v478_v16, 0.0  ;;  %v489_v16 = vmul.f32 %v1276_v6, %v1493_v26  ;;  %v493_v35 = vmul.f32 %v1276_v6, %v1569_v56 }
  0x1c   :  { %v106_v53 = vmul.f32 %v74_v38, %v42_v31  ;;  %v562_v24 = vsel %vm138_vm0, %v488_v8, 0.0  ;;  %v496_v31 = vmul.f32 %v1276_v6, %v120_v14  ;;  %v495_v38 = vmul.f32 %v1276_v6, %v119_v10 }
  0x1d   :  { %1030 = vmatmul.mubr.msk.f32.gmra.mxu0 %vm138_vm0, %v1335_v30  ;;  %1054 = vmatmul.mubr.msk.f32.gmra.mxu1 %vm138_vm0, %v1491_v25  ;;  %v480_v30 = vmul.f32 %v1276_v6, %v1503_v29  ;;  %v565_v25 = vsel %vm138_vm0, %v489_v16, 0.0 }
  0x1e   :  { %527 = vadd.xlane.f32.xlu1 %v526_v32  ;;  %524 = vadd.xlane.f32.xlu0 %v523_v33  ;;  %v482_v61 = vmul.f32 %v1276_v6, %v106_v53  ;;  %v491_v32 = vmul.f32 %v1276_v6, %v1540_v43  ;;  %v586_v39 = vsel %vm138_vm0, %v496_v31, 0.0  ;;  %v583_v40 = vsel %vm138_vm0, %v495_v38, 0.0 }
  0x1f   :  { %1032 = vmatprep.mubr.msk.f32.mxu0 %vm138_vm0, %v1383_v49  ;;  %1056 = vmatprep.mubr.msk.f32.mxu1 %vm138_vm0, %v1493_v26  ;;  %v1567_v49 = vmul.f32 %v84_v46, %v52_v44  ;;  %v1675_v46 = vld [vmem:[#allocation2] ss:$0 sm:$0xff] }
  0x20   :  { %v571_v34 = vsel %vm138_vm0, %v491_v32, 0.0 }
  0x21   :  { %1033 = vmatmul.mubr.msk.f32.gmra.mxu0 %vm138_vm0, %v1373_v45  ;;  %1057 = vmatmul.mubr.msk.f32.gmra.mxu1 %vm138_vm0, %v1537_v41  ;;  %v538_v45 = vsel %vm138_vm0, %v480_v30, 0.0  ;;  %v498_v41 = vmul.f32 %v1276_v6, %v122_v9 }
  0x22   :  { %533 = vadd.xlane.f32.xlu1 %v532_v42  ;;  %530 = vadd.xlane.f32.xlu0 %v529_v47  ;;  %v497_v42 = vmul.f32 %v1276_v6, %v121_v19 }
  0x23   :  { %1035 = vmatprep.mubr.msk.f32.mxu0 %vm138_vm0, %v1423_v2  ;;  %1059 = vmatprep.mubr.msk.f32.mxu1 %vm138_vm0, %v1540_v43  ;;  %v118_v2 = vmul.f32 %v86_v59, %v54_v58  ;;  %v592_v43 = vsel %vm138_vm0, %v498_v41, 0.0 }
  0x24   :  { %v589_v44 = vsel %vm138_vm0, %v497_v42, 0.0 }
  0x25   :  { %1036 = vmatmul.mubr.msk.f32.gmra.mxu0 %vm138_vm0, %v1421_v1  ;;  %1060 = vmatmul.mubr.msk.f32.gmra.mxu1 %vm138_vm0, %v1567_v49  ;;  %v544_v1 = vsel %vm138_vm0, %v482_v61, 0.0  ;;  %v494_v26 = vmul.f32 %v1276_v6, %v118_v2 }
  0x26   :  { %539 = vadd.xlane.f32.xlu1 %v538_v45  ;;  %536 = vadd.xlane.f32.xlu0 %v535_v60 }
  0x27   :  { %1038 = vmatprep.mubr.msk.f32.mxu0 %vm138_vm0, %v1473_v21  ;;  %1062 = vmatprep.mubr.msk.f32.mxu1 %vm138_vm0, %v1569_v56  ;;  %v485_v21 = vmul.f32 %v1276_v6, %v1402_v57  ;;  %v487_v57 = vmul.f32 %v1276_v6, %v1448_v11  ;;  %v568_v11 = vsel %vm138_vm0, %v490_v28, 0.0  ;;  %v580_v36 = vsel %vm138_vm0, %v494_v26, 0.0 }
  0x29   :  { %1039 = vmatmul.mubr.msk.f32.gmra.mxu0 %vm138_vm0, %v1459_v15  ;;  %1063 = vmatmul.mubr.msk.f32.gmra.mxu1 %vm138_vm0, %v118_v2  ;;  %v547_v15 = vsel %vm138_vm0, %v483_v12, 0.0  ;;  %v553_v23 = vsel %vm138_vm0, %v485_v21, 0.0  ;;  %v559_v27 = vsel %vm138_vm0, %v487_v57, 0.0 }
  0x2a   :  { %545 = vadd.xlane.f32.xlu1 %v544_v1  ;;  %542 = vadd.xlane.f32.xlu0 %v541_v7 }
  0x2b   :  { %1041 = vmatprep.mubr.msk.f32.mxu0 %vm138_vm0, %v1519_v37  ;;  %1065 = vmatprep.mubr.msk.f32.mxu1 %vm138_vm0, %v119_v10  ;;  %v577_v37 = vsel %vm138_vm0, %v493_v35, 0.0 }
  0x2d   :  { %1042 = vmatmul.mubr.msk.f32.gmra.mxu0 %vm138_vm0, %v1503_v29  ;;  %1066 = vmatmul.mubr.msk.f32.gmra.mxu1 %vm138_vm0, %v120_v14  ;;  %v492_v29 = vmul.f32 %v1276_v6, %v1567_v49 }
  0x2e   :  { %551 = vadd.xlane.f32.xlu1 %v550_v17  ;;  %548 = vadd.xlane.f32.xlu0 %v547_v15 }
  0x2f   :  { %1044 = vmatprep.mubr.msk.f32.mxu0 %vm138_vm0, %v105_v54  ;;  %1068 = vmatprep.mubr.msk.f32.mxu1 %vm138_vm0, %v121_v19  ;;  %v574_v33 = vsel %vm138_vm0, %v492_v29, 0.0 }
  0x31   :  { %1045 = vmatmul.mubr.msk.f32.gmra.mxu0 %vm138_vm0, %v106_v53  ;;  %1069 = vmatmul.mubr.msk.f32.gmra.mxu1 %vm138_vm0, %v122_v9 }
  0x32   :  { %557 = vadd.xlane.f32.xlu1 %v556_v22  ;;  %554 = vadd.xlane.f32.xlu0 %v553_v23 }
  0x36   :  { %563 = vadd.xlane.f32.xlu1 %v562_v24  ;;  %560 = vadd.xlane.f32.xlu0 %v559_v27 }
  0x3a   :  { %569 = vadd.xlane.f32.xlu1 %v568_v11  ;;  %566 = vadd.xlane.f32.xlu0 %v565_v25 }
  0x3e   :  { %575 = vadd.xlane.f32.xlu1 %v574_v33  ;;  %572 = vadd.xlane.f32.xlu0 %v571_v34 }
  0x42   :  { %581 = vadd.xlane.f32.xlu1 %v580_v36  ;;  %578 = vadd.xlane.f32.xlu0 %v577_v37 }
  0x46   :  { %587 = vadd.xlane.f32.xlu1 %v586_v39  ;;  %584 = vadd.xlane.f32.xlu0 %v583_v40 }
  0x4a   :  { %593 = vadd.xlane.f32.xlu1 %v592_v43  ;;  %590 = vadd.xlane.f32.xlu0 %v589_v44 }
  0x95   :  { %v507_v30 = vpop.xlane.xlu1 %506  ;;  %v501_v47 = vpop.xlane.xlu0 %500 }
  0x96   :  { %v604_v48 = vadd.f32 %v1675_v46, %v507_v30  ;;  %v602_v50 = vadd.f32 %v1675_v46, %v501_v47 }
  0x98   :  { %v937_v52 = vmul.f32 -1.442695, %v604_v48  ;;  %v935_v53 = vmul.f32 -1.442695, %v602_v50 }
  0x9a   :  { %1087 = vpow2.f32 %v937_v52  ;;  %v510_v6 = vpop.xlane.xlu1 %509  ;;  %v504_v54 = vpop.xlane.xlu0 %503 }
  0x9b   :  { %1089 = vpow2.f32 %v935_v53  ;;  %v605_v49 = vadd.f32 %v1675_v46, %v510_v6  ;;  %v603_v56 = vadd.f32 %v1675_v46, %v504_v54 }
  0x9d   :  { %v938_v58 = vmul.f32 -1.442695, %v605_v49  ;;  %v936_v59 = vmul.f32 -1.442695, %v603_v56 }
  0x9f   :  { %1091 = vpow2.f32 %v938_v58  ;;  %v516_v45 = vpop.xlane.xlu1 %515  ;;  %v513_v60 = vpop.xlane.xlu0 %512 }
  0xa0   :  { %1093 = vpow2.f32 %v936_v59  ;;  %v607_v61 = vadd.f32 %v1675_v46, %v516_v45  ;;  %v606_v62 = vadd.f32 %v1675_v46, %v513_v60 }
  0xa2   :  { %v940_v63 = vmul.f32 -1.442695, %v607_v61  ;;  %v939_v0 = vmul.f32 -1.442695, %v606_v62 }
  0xa3   :  { %v522_v2 = vpop.xlane.xlu1 %521  ;;  %v519_v3 = vpop.xlane.xlu0 %518 }
  0xa4   :  { %1095 = vpow2.f32 %v940_v63  ;;  %v609_v4 = vadd.f32 %v1675_v46, %v522_v2  ;;  %v608_v5 = vadd.f32 %v1675_v46, %v519_v3 }
  0xa5   :  { %1097 = vpow2.f32 %v939_v0 }
  0xa6   :  { %v942_v1 = vmul.f32 -1.442695, %v609_v4  ;;  %v941_v7 = vmul.f32 -1.442695, %v608_v5 }
  0xa7   :  { %v1088_v10 = vpop.eup %1087  ;;  %v528_v12 = vpop.xlane.xlu1 %527 }
  0xa8   :  { %v525_v13 = vpop.xlane.xlu0 %524  ;;  %v1090_v55 = vpop.eup %1089  ;;  %v765_v14 = vadd.f32 1.0, %v1088_v10  ;;  %1099 = vpow2.f32 %v942_v1  ;;  %v611_v17 = vadd.f32 %v1675_v46, %v528_v12 }
  0xa9   :  { %v610_v51 = vadd.f32 %v1675_v46, %v525_v13  ;;  %v763_v18 = vadd.f32 1.0, %v1090_v55  ;;  %1101 = vpow2.f32 %v941_v7 }
  0xaa   :  { %1103 = vrcp.f32 %v765_v14  ;;  %v944_v15 = vmul.f32 -1.442695, %v611_v17 }
  0xab   :  { %v943_v19 = vmul.f32 -1.442695, %v610_v51  ;;  %1105 = vrcp.f32 %v763_v18  ;;  %v534_v20 = vpop.xlane.xlu1 %533 }
  0xac   :  { %v531_v21 = vpop.xlane.xlu0 %530  ;;  %v1092_v9 = vpop.eup %1091  ;;  %1107 = vpow2.f32 %v944_v15  ;;  %v613_v22 = vadd.f32 %v1675_v46, %v534_v20 }
  0xad   :  { %v612_v23 = vadd.f32 %v1675_v46, %v531_v21  ;;  %v1094_v8 = vpop.eup %1093  ;;  %v766_v57 = vadd.f32 1.0, %v1092_v9  ;;  %1109 = vpow2.f32 %v943_v19 }
  0xae   :  { %v764_v24 = vadd.f32 1.0, %v1094_v8  ;;  %v946_v27 = vmul.f32 -1.442695, %v613_v22 }
  0xaf   :  { %v945_v28 = vmul.f32 -1.442695, %v612_v23  ;;  %1111 = vrcp.f32 %v766_v57  ;;  %v540_v16 = vpop.xlane.xlu1 %539 }
  0xb0   :  { %v537_v11 = vpop.xlane.xlu0 %536  ;;  %1113 = vrcp.f32 %v764_v24  ;;  %v615_v25 = vadd.f32 %v1675_v46, %v540_v16 }
  0xb1   :  { %v614_v29 = vadd.f32 %v1675_v46, %v537_v11  ;;  %v1096_v32 = vpop.eup %1095  ;;  %1115 = vpow2.f32 %v946_v27 }
  0xb2   :  { %v1098_v33 = vpop.eup %1097  ;;  %v768_v34 = vadd.f32 1.0, %v1096_v32  ;;  %1117 = vpow2.f32 %v945_v28  ;;  %v948_v26 = vmul.f32 -1.442695, %v615_v25 }
  0xb3   :  { %v767_v35 = vadd.f32 1.0, %v1098_v33  ;;  %v947_v36 = vmul.f32 -1.442695, %v614_v29  ;;  %v546_v37 = vpop.xlane.xlu1 %545 }
  0xb4   :  { %v543_v31 = vpop.xlane.xlu0 %542  ;;  %1119 = vrcp.f32 %v768_v34  ;;  %v617_v38 = vadd.f32 %v1675_v46, %v546_v37 }
  0xb5   :  { %v616_v39 = vadd.f32 %v1675_v46, %v543_v31  ;;  %v1100_v40 = vpop.eup %1099  ;;  %1121 = vrcp.f32 %v767_v35 }
  0xb6   :  { %v1102_v41 = vpop.eup %1101  ;;  %v770_v42 = vadd.f32 1.0, %v1100_v40  ;;  %1123 = vpow2.f32 %v948_v26  ;;  %v950_v43 = vmul.f32 -1.442695, %v617_v38 }
  0xb7   :  { %v1104_v44 = vpop.eup %1103  ;;  %v769_v30 = vadd.f32 1.0, %v1102_v41  ;;  %1125 = vpow2.f32 %v947_v36  ;;  %v949_v47 = vmul.f32 -1.442695, %v616_v39  ;;  %v552_v48 = vpop.xlane.xlu1 %551 }
  0xb8   :  { %v549_v50 = vpop.xlane.xlu0 %548  ;;  %v1106_v52 = vpop.eup %1105  ;;  %862 = vst.msk [vmem:[%s2007_s7 + $0x10] sm:$0xff] %vm859_vm1, %v1104_v44  ;;  %1127 = vrcp.f32 %v770_v42  ;;  %v619_v53 = vadd.f32 %v1675_v46, %v552_v48 }
  0xb9   :  { %v618_v6 = vadd.f32 %v1675_v46, %v549_v50  ;;  %v1108_v54 = vpop.eup %1107  ;;  %860 = vst.msk [vmem:[%s2007_s7] sm:$0xff] %vm859_vm1, %v1106_v52  ;;  %1129 = vrcp.f32 %v769_v30 }
  0xba   :  { %v1110_v49 = vpop.eup %1109  ;;  %v772_v56 = vadd.f32 1.0, %v1108_v54  ;;  %1131 = vpow2.f32 %v950_v43  ;;  %v952_v58 = vmul.f32 -1.442695, %v619_v53 }
  0xbb   :  { %v771_v59 = vadd.f32 1.0, %v1110_v49  ;;  %1133 = vpow2.f32 %v949_v47  ;;  %v951_v45 = vmul.f32 -1.442695, %v618_v6  ;;  %v558_v60 = vpop.xlane.xlu1 %557 }
  0xbc   :  { %v555_v61 = vpop.xlane.xlu0 %554  ;;  %v1112_v62 = vpop.eup %1111  ;;  %1135 = vrcp.f32 %v772_v56  ;;  %v621_v63 = vadd.f32 %v1675_v46, %v558_v60 }
  0xbd   :  { %v620_v0 = vadd.f32 %v1675_v46, %v555_v61  ;;  %v1114_v2 = vpop.eup %1113  ;;  %863 = vst.msk [vmem:[%s2007_s7 + $0x18] sm:$0xff] %vm859_vm1, %v1112_v62  ;;  %1137 = vrcp.f32 %v771_v59 }
  0xbe   :  { %v1116_v3 = vpop.eup %1115  ;;  %861 = vst.msk [vmem:[%s2007_s7 + $0x8] sm:$0xff] %vm859_vm1, %v1114_v2  ;;  %1139 = vpow2.f32 %v952_v58  ;;  %v954_v4 = vmul.f32 -1.442695, %v621_v63 }
  0xbf   :  { %v1118_v5 = vpop.eup %1117  ;;  %v774_v1 = vadd.f32 1.0, %v1116_v3  ;;  %1141 = vpow2.f32 %v951_v45  ;;  %v953_v7 = vmul.f32 -1.442695, %v620_v0  ;;  %v564_v10 = vpop.xlane.xlu1 %563 }
  0xc0   :  { %v561_v12 = vpop.xlane.xlu0 %560  ;;  %v773_v13 = vadd.f32 1.0, %v1118_v5  ;;  %1143 = vpow2.f32 %v954_v4  ;;  %v623_v55 = vadd.f32 %v1675_v46, %v564_v10 }
  0xc1   :  { %v622_v14 = vadd.f32 %v1675_v46, %v561_v12  ;;  %v1120_v17 = vpop.eup %1119  ;;  %1145 = vrcp.f32 %v774_v1 }
  0xc2   :  { %v1122_v51 = vpop.eup %1121  ;;  %865 = vst.msk [vmem:[%s2007_s7 + $0x28] sm:$0xff] %vm859_vm1, %v1120_v17  ;;  %1147 = vrcp.f32 %v773_v13  ;;  %v956_v18 = vmul.f32 -1.442695, %v623_v55  ;;  %v1764_v13 = vld [vmem:[%s2008_s3] ss:$0 sm:$0xff] }
  0xc3   :  { %v955_v15 = vmul.f32 -1.442695, %v622_v14  ;;  %v1124_v19 = vpop.eup %1123  ;;  %864 = vst.msk [vmem:[%s2007_s7 + $0x20] sm:$0xff] %vm859_vm1, %v1122_v51  ;;  %1149 = vpow2.f32 %v953_v7  ;;  %v570_v20 = vpop.xlane.xlu1 %569 }
  0xc4   :  { %v567_v21 = vpop.xlane.xlu0 %566  ;;  %v1126_v9 = vpop.eup %1125  ;;  %v776_v22 = vadd.f32 1.0, %v1124_v19  ;;  %1151 = vpow2.f32 %v956_v18  ;;  %v625_v23 = vadd.f32 %v1675_v46, %v570_v20 }
  0xc5   :  { %v624_v8 = vadd.f32 %v1675_v46, %v567_v21  ;;  %v1128_v57 = vpop.eup %1127  ;;  %v775_v24 = vadd.f32 1.0, %v1126_v9  ;;  %1153 = vpow2.f32 %v955_v15 }
  0xc6   :  { %v1130_v27 = vpop.eup %1129  ;;  %867 = vst.msk [vmem:[%s2007_s7 + $0x38] sm:$0xff] %vm859_vm1, %v1128_v57  ;;  %1155 = vrcp.f32 %v776_v22  ;;  %v958_v28 = vmul.f32 -1.442695, %v625_v23 }
  0xc7   :  { %v957_v16 = vmul.f32 -1.442695, %v624_v8  ;;  %v1132_v11 = vpop.eup %1131  ;;  %866 = vst.msk [vmem:[%s2007_s7 + $0x30] sm:$0xff] %vm859_vm1, %v1130_v27  ;;  %1157 = vrcp.f32 %v775_v24  ;;  %v576_v25 = vpop.xlane.xlu1 %575 }
  0xc8   :  { %v573_v29 = vpop.xlane.xlu0 %572  ;;  %v1134_v32 = vpop.eup %1133  ;;  %v778_v33 = vadd.f32 1.0, %v1132_v11  ;;  %1159 = vpow2.f32 %v958_v28  ;;  %v627_v34 = vadd.f32 %v1675_v46, %v576_v25 }
  0xc9   :  { %v626_v26 = vadd.f32 %v1675_v46, %v573_v29  ;;  %v1136_v35 = vpop.eup %1135  ;;  %v777_v36 = vadd.f32 1.0, %v1134_v32  ;;  %1161 = vpow2.f32 %v957_v16 }
  0xca   :  { %v1138_v37 = vpop.eup %1137  ;;  %869 = vst.msk [vmem:[%s2007_s7 + $0x48] sm:$0xff] %vm859_vm1, %v1136_v35  ;;  %1163 = vrcp.f32 %v778_v33  ;;  %v960_v31 = vmul.f32 -1.442695, %v627_v34 }
  0xcb   :  { %v959_v38 = vmul.f32 -1.442695, %v626_v26  ;;  %v1140_v39 = vpop.eup %1139  ;;  %868 = vst.msk [vmem:[%s2007_s7 + $0x40] sm:$0xff] %vm859_vm1, %v1138_v37  ;;  %1165 = vrcp.f32 %v777_v36  ;;  %v582_v40 = vpop.xlane.xlu1 %581 }
  0xcc   :  { %v579_v41 = vpop.xlane.xlu0 %578  ;;  %v1142_v42 = vpop.eup %1141  ;;  %v780_v43 = vadd.f32 1.0, %v1140_v39  ;;  %1167 = vpow2.f32 %v960_v31  ;;  %v629_v44 = vadd.f32 %v1675_v46, %v582_v40 }
  0xcd   :  { %v628_v30 = vadd.f32 %v1675_v46, %v579_v41  ;;  %v1144_v47 = vpop.eup %1143  ;;  %v779_v48 = vadd.f32 1.0, %v1142_v42  ;;  %1169 = vpow2.f32 %v959_v38 }
  0xce   :  { %v1146_v50 = vpop.eup %1145  ;;  %1171 = vrcp.f32 %v780_v43  ;;  %v782_v52 = vadd.f32 1.0, %v1144_v47  ;;  %v962_v53 = vmul.f32 -1.442695, %v629_v44 }
  0xcf   :  { %v961_v6 = vmul.f32 -1.442695, %v628_v30  ;;  %v1148_v54 = vpop.eup %1147  ;;  %871 = vst.msk [vmem:[%s2007_s7 + $0x58] sm:$0xff] %vm859_vm1, %v1146_v50  ;;  %1173 = vrcp.f32 %v779_v48  ;;  %v588_v49 = vpop.xlane.xlu1 %587 }
  0xd0   :  { %v585_v56 = vpop.xlane.xlu0 %584  ;;  %v1150_v58 = vpop.eup %1149  ;;  %870 = vst.msk [vmem:[%s2007_s7 + $0x50] sm:$0xff] %vm859_vm1, %v1148_v54  ;;  %1175 = vrcp.f32 %v782_v52  ;;  %v631_v59 = vadd.f32 %v1675_v46, %v588_v49 }
  0xd1   :  { %v630_v45 = vadd.f32 %v1675_v46, %v585_v56  ;;  %v1152_v60 = vpop.eup %1151  ;;  %v781_v61 = vadd.f32 1.0, %v1150_v58  ;;  %1177 = vpow2.f32 %v962_v53 }
  0xd2   :  { %v1154_v62 = vpop.eup %1153  ;;  %v784_v63 = vadd.f32 1.0, %v1152_v60  ;;  %1179 = vpow2.f32 %v961_v6  ;;  %v964_v0 = vmul.f32 -1.442695, %v631_v59 }
  0xd3   :  { %v1156_v2 = vpop.eup %1155  ;;  %1181 = vrcp.f32 %v781_v61  ;;  %v783_v3 = vadd.f32 1.0, %v1154_v62  ;;  %v963_v4 = vmul.f32 -1.442695, %v630_v45  ;;  %v594_v5 = vpop.xlane.xlu1 %593 }
  0xd4   :  { %v591_v1 = vpop.xlane.xlu0 %590  ;;  %v1158_v7 = vpop.eup %1157  ;;  %873 = vst.msk [vmem:[%s2007_s7 + $0x68] sm:$0xff] %vm859_vm1, %v1156_v2  ;;  %1183 = vrcp.f32 %v784_v63  ;;  %v633_v10 = vadd.f32 %v1675_v46, %v594_v5 }
  0xd5   :  { %v632_v12 = vadd.f32 %v1675_v46, %v591_v1  ;;  %v1160_v55 = vpop.eup %1159  ;;  %872 = vst.msk [vmem:[%s2007_s7 + $0x60] sm:$0xff] %vm859_vm1, %v1158_v7  ;;  %1185 = vrcp.f32 %v783_v3  ;;  %v1025_v14 = vpop.f32.mrf.mxu0 }
  0xd6   :  { %v1049_v17 = vpop.f32.mrf.mxu1  ;;  %v1162_v51 = vpop.eup %1161  ;;  %v786_v18 = vadd.f32 1.0, %v1160_v55  ;;  %1187 = vpow2.f32 %v964_v0  ;;  %v966_v15 = vmul.f32 -1.442695, %v633_v10  ;;  %v307_v21 = vadd.f32 %v1025_v14, %v1764_v13 }
  0xd7   :  { %v965_v46 = vmul.f32 -1.442695, %v632_v12  ;;  %v1164_v19 = vpop.eup %1163  ;;  %v785_v20 = vadd.f32 1.0, %v1162_v51  ;;  %1189 = vpow2.f32 %v963_v4  ;;  %v387_v9 = vadd.f32 %v1049_v17, %v1764_v13  ;;  %v301_v22 = vpop.f32.mrf.mxu0 }
  0xd8   :  { %v381_v23 = vpop.f32.mrf.mxu1  ;;  %v1166_v8 = vpop.eup %1165  ;;  %875 = vst.msk [vmem:[%s2007_s7 + $0x78] sm:$0xff] %vm859_vm1, %v1164_v19  ;;  %1191 = vrcp.f32 %v786_v18  ;;  %v302_v57 = vadd.f32 %v1764_v13, %v301_v22 }
  0xd9   :  { %v382_v24 = vadd.f32 %v1764_v13, %v381_v23  ;;  %v1168_v27 = vpop.eup %1167  ;;  %874 = vst.msk [vmem:[%s2007_s7 + $0x70] sm:$0xff] %vm859_vm1, %v1166_v8  ;;  %1193 = vrcp.f32 %v785_v20  ;;  %v1028_v28 = vpop.f32.mrf.mxu0 }
  0xda   :  { %636 = vst.msk [vmem:[%s2009_s6 + $0x8] sm:$0xff] %vm634_vm2, %v307_v21  ;;  %652 = vst.msk [vmem:[%s2009_s6 + $0x88] sm:$0xff] %vm634_vm2, %v387_v9  ;;  %v1052_v16 = vpop.f32.mrf.mxu1  ;;  %v1170_v11 = vpop.eup %1169  ;;  %v788_v25 = vadd.f32 1.0, %v1168_v27  ;;  %1195 = vpow2.f32 %v966_v15  ;;  %v317_v29 = vadd.f32 %v1028_v28, %v1764_v13 }
  0xdb   :  { %635 = vst.msk [vmem:[%s2009_s6] sm:$0xff] %vm634_vm2, %v302_v57  ;;  %651 = vst.msk [vmem:[%s2009_s6 + $0x80] sm:$0xff] %vm634_vm2, %v382_v24  ;;  %v397_v32 = vadd.f32 %v1052_v16, %v1764_v13  ;;  %v1172_v33 = vpop.eup %1171  ;;  %v787_v34 = vadd.f32 1.0, %v1170_v11  ;;  %1197 = vpow2.f32 %v965_v46  ;;  %v311_v26 = vpop.f32.mrf.mxu0 }
  0xdc   :  { %v391_v35 = vpop.f32.mrf.mxu1  ;;  %v1174_v36 = vpop.eup %1173  ;;  %877 = vst.msk [vmem:[%s2007_s7 + $0x88] sm:$0xff] %vm859_vm1, %v1172_v33  ;;  %1199 = vrcp.f32 %v788_v25  ;;  %v312_v37 = vadd.f32 %v1764_v13, %v311_v26 }
  0xdd   :  { %638 = vst.msk [vmem:[%s2009_s6 + $0x18] sm:$0xff] %vm634_vm2, %v317_v29  ;;  %654 = vst.msk [vmem:[%s2009_s6 + $0x98] sm:$0xff] %vm634_vm2, %v397_v32  ;;  %v392_v31 = vadd.f32 %v1764_v13, %v391_v35  ;;  %v1176_v38 = vpop.eup %1175  ;;  %1201 = vrcp.f32 %v787_v34  ;;  %v1031_v39 = vpop.f32.mrf.mxu0 }
  0xde   :  { %876 = vst.msk [vmem:[%s2007_s7 + $0x80] sm:$0xff] %vm859_vm1, %v1174_v36  ;;  %v1055_v40 = vpop.f32.mrf.mxu1  ;;  %v1178_v41 = vpop.eup %1177  ;;  %879 = vst.msk [vmem:[%s2007_s7 + $0x98] sm:$0xff] %vm859_vm1, %v1176_v38  ;;  %v327_v42 = vadd.f32 %v1031_v39, %v1764_v13 }
  0xdf   :  { %637 = vst.msk [vmem:[%s2009_s6 + $0x10] sm:$0xff] %vm634_vm2, %v312_v37  ;;  %653 = vst.msk [vmem:[%s2009_s6 + $0x90] sm:$0xff] %vm634_vm2, %v392_v31  ;;  %v407_v43 = vadd.f32 %v1055_v40, %v1764_v13  ;;  %v1180_v44 = vpop.eup %1179  ;;  %v790_v30 = vadd.f32 1.0, %v1178_v41  ;;  %v321_v47 = vpop.f32.mrf.mxu0 }
  0xe0   :  { %v401_v48 = vpop.f32.mrf.mxu1  ;;  %v1182_v50 = vpop.eup %1181  ;;  %v789_v52 = vadd.f32 1.0, %v1180_v44  ;;  %640 = vst.msk [vmem:[%s2009_s6 + $0x28] sm:$0xff] %vm634_vm2, %v327_v42  ;;  %v322_v53 = vadd.f32 %v1764_v13, %v321_v47 }
  0xe1   :  { %656 = vst.msk [vmem:[%s2009_s6 + $0xa8] sm:$0xff] %vm634_vm2, %v407_v43  ;;  %v402_v6 = vadd.f32 %v1764_v13, %v401_v48  ;;  %v1184_v54 = vpop.eup %1183  ;;  %1203 = vrcp.f32 %v790_v30  ;;  %v1034_v49 = vpop.f32.mrf.mxu0 }
  0xe2   :  { %878 = vst.msk [vmem:[%s2007_s7 + $0x90] sm:$0xff] %vm859_vm1, %v1182_v50  ;;  %v1058_v56 = vpop.f32.mrf.mxu1  ;;  %v1186_v58 = vpop.eup %1185  ;;  %881 = vst.msk [vmem:[%s2007_s7 + $0xa8] sm:$0xff] %vm859_vm1, %v1184_v54  ;;  %1205 = vrcp.f32 %v789_v52  ;;  %v337_v59 = vadd.f32 %v1034_v49, %v1764_v13 }
  0xe3   :  { %639 = vst.msk [vmem:[%s2009_s6 + $0x20] sm:$0xff] %vm634_vm2, %v322_v53  ;;  %655 = vst.msk [vmem:[%s2009_s6 + $0xa0] sm:$0xff] %vm634_vm2, %v402_v6  ;;  %v417_v45 = vadd.f32 %v1058_v56, %v1764_v13  ;;  %v1188_v60 = vpop.eup %1187  ;;  %v331_v61 = vpop.f32.mrf.mxu0 }
  0xe4   :  { %880 = vst.msk [vmem:[%s2007_s7 + $0xa0] sm:$0xff] %vm859_vm1, %v1186_v58  ;;  %v411_v62 = vpop.f32.mrf.mxu1  ;;  %v1190_v63 = vpop.eup %1189  ;;  %v792_v0 = vadd.f32 1.0, %v1188_v60  ;;  %v332_v2 = vadd.f32 %v1764_v13, %v331_v61 }
  0xe5   :  { %642 = vst.msk [vmem:[%s2009_s6 + $0x38] sm:$0xff] %vm634_vm2, %v337_v59  ;;  %658 = vst.msk [vmem:[%s2009_s6 + $0xb8] sm:$0xff] %vm634_vm2, %v417_v45  ;;  %v412_v3 = vadd.f32 %v1764_v13, %v411_v62  ;;  %v1192_v4 = vpop.eup %1191  ;;  %v791_v5 = vadd.f32 1.0, %v1190_v63  ;;  %v1037_v1 = vpop.f32.mrf.mxu0 }
  0xe6   :  { %v1061_v7 = vpop.f32.mrf.mxu1  ;;  %v1194_v10 = vpop.eup %1193  ;;  %883 = vst.msk [vmem:[%s2007_s7 + $0xb8] sm:$0xff] %vm859_vm1, %v1192_v4  ;;  %1207 = vrcp.f32 %v792_v0  ;;  %v347_v12 = vadd.f32 %v1037_v1, %v1764_v13 }
  0xe7   :  { %641 = vst.msk [vmem:[%s2009_s6 + $0x30] sm:$0xff] %vm634_vm2, %v332_v2  ;;  %657 = vst.msk [vmem:[%s2009_s6 + $0xb0] sm:$0xff] %vm634_vm2, %v412_v3  ;;  %v427_v55 = vadd.f32 %v1061_v7, %v1764_v13  ;;  %v1196_v14 = vpop.eup %1195  ;;  %1209 = vrcp.f32 %v791_v5  ;;  %v341_v17 = vpop.f32.mrf.mxu0 }
  0xe8   :  { %882 = vst.msk [vmem:[%s2007_s7 + $0xb0] sm:$0xff] %vm859_vm1, %v1194_v10  ;;  %v421_v51 = vpop.f32.mrf.mxu1  ;;  %v1198_v18 = vpop.eup %1197  ;;  %v794_v15 = vadd.f32 1.0, %v1196_v14  ;;  %v342_v46 = vadd.f32 %v1764_v13, %v341_v17 }
  0xe9   :  { %644 = vst.msk [vmem:[%s2009_s6 + $0x48] sm:$0xff] %vm634_vm2, %v347_v12  ;;  %660 = vst.msk [vmem:[%s2009_s6 + $0xc8] sm:$0xff] %vm634_vm2, %v427_v55  ;;  %v422_v19 = vadd.f32 %v1764_v13, %v421_v51  ;;  %v1200_v20 = vpop.eup %1199  ;;  %v793_v21 = vadd.f32 1.0, %v1198_v18  ;;  %v1040_v9 = vpop.f32.mrf.mxu0 }
  0xea   :  { %v1064_v22 = vpop.f32.mrf.mxu1  ;;  %v1202_v23 = vpop.eup %1201  ;;  %885 = vst.msk [vmem:[%s2007_s7 + $0xc8] sm:$0xff] %vm859_vm1, %v1200_v20  ;;  %1211 = vrcp.f32 %v794_v15  ;;  %v357_v8 = vadd.f32 %v1040_v9, %v1764_v13 }
  0xeb   :  { %643 = vst.msk [vmem:[%s2009_s6 + $0x40] sm:$0xff] %vm634_vm2, %v342_v46  ;;  %659 = vst.msk [vmem:[%s2009_s6 + $0xc0] sm:$0xff] %vm634_vm2, %v422_v19  ;;  %v437_v57 = vadd.f32 %v1064_v22, %v1764_v13  ;;  %1213 = vrcp.f32 %v793_v21  ;;  %v351_v24 = vpop.f32.mrf.mxu0 }
  0xec   :  { %884 = vst.msk [vmem:[%s2007_s7 + $0xc0] sm:$0xff] %vm859_vm1, %v1202_v23  ;;  %v431_v27 = vpop.f32.mrf.mxu1  ;;  %v352_v28 = vadd.f32 %v1764_v13, %v351_v24 }
  0xed   :  { %646 = vst.msk [vmem:[%s2009_s6 + $0x58] sm:$0xff] %vm634_vm2, %v357_v8  ;;  %662 = vst.msk [vmem:[%s2009_s6 + $0xd8] sm:$0xff] %vm634_vm2, %v437_v57  ;;  %v432_v16 = vadd.f32 %v1764_v13, %v431_v27  ;;  %v1043_v11 = vpop.f32.mrf.mxu0 }
  0xee   :  { %v1067_v25 = vpop.f32.mrf.mxu1  ;;  %v1204_v29 = vpop.eup %1203  ;;  %645 = vst.msk [vmem:[%s2009_s6 + $0x50] sm:$0xff] %vm634_vm2, %v352_v28  ;;  %v367_v32 = vadd.f32 %v1043_v11, %v1764_v13 }
  0xef   :  { %661 = vst.msk [vmem:[%s2009_s6 + $0xd0] sm:$0xff] %vm634_vm2, %v432_v16  ;;  %v447_v33 = vadd.f32 %v1067_v25, %v1764_v13  ;;  %v1206_v34 = vpop.eup %1205  ;;  %v361_v26 = vpop.f32.mrf.mxu0 }
  0xf0   :  { %887 = vst.msk [vmem:[%s2007_s7 + $0xd8] sm:$0xff] %vm859_vm1, %v1204_v29  ;;  %v441_v35 = vpop.f32.mrf.mxu1  ;;  %886 = vst.msk [vmem:[%s2007_s7 + $0xd0] sm:$0xff] %vm859_vm1, %v1206_v34  ;;  %v362_v36 = vadd.f32 %v1764_v13, %v361_v26 }
  0xf1   :  { %648 = vst.msk [vmem:[%s2009_s6 + $0x68] sm:$0xff] %vm634_vm2, %v367_v32  ;;  %664 = vst.msk [vmem:[%s2009_s6 + $0xe8] sm:$0xff] %vm634_vm2, %v447_v33  ;;  %v442_v37 = vadd.f32 %v1764_v13, %v441_v35  ;;  %v1046_v31 = vpop.f32.mrf.mxu0 }
  0xf2   :  { %v1070_v38 = vpop.f32.mrf.mxu1  ;;  %647 = vst.msk [vmem:[%s2009_s6 + $0x60] sm:$0xff] %vm634_vm2, %v362_v36  ;;  %v377_v39 = vadd.f32 %v1046_v31, %v1764_v13 }
  0xf3   :  { %663 = vst.msk [vmem:[%s2009_s6 + $0xe0] sm:$0xff] %vm634_vm2, %v442_v37  ;;  %v457_v40 = vadd.f32 %v1070_v38, %v1764_v13  ;;  %v1208_v41 = vpop.eup %1207  ;;  %v371_v42 = vpop.f32.mrf.mxu0 }
  0xf4   :  { %v451_v43 = vpop.f32.mrf.mxu1  ;;  %v1210_v44 = vpop.eup %1209  ;;  %889 = vst.msk [vmem:[%s2007_s7 + $0xe8] sm:$0xff] %vm859_vm1, %v1208_v41  ;;  %v372_v30 = vadd.f32 %v1764_v13, %v371_v42 }
  0xf5   :  { %650 = vst.msk [vmem:[%s2009_s6 + $0x78] sm:$0xff] %vm634_vm2, %v377_v39  ;;  %666 = vst.msk [vmem:[%s2009_s6 + $0xf8] sm:$0xff] %vm634_vm2, %v457_v40  ;;  %v452_v47 = vadd.f32 %v1764_v13, %v451_v43 }
  0xf6   :  { %888 = vst.msk [vmem:[%s2007_s7 + $0xe0] sm:$0xff] %vm859_vm1, %v1210_v44 }
  0xf7   :  { %649 = vst.msk [vmem:[%s2009_s6 + $0x70] sm:$0xff] %vm634_vm2, %v372_v30  ;;  %665 = vst.msk [vmem:[%s2009_s6 + $0xf0] sm:$0xff] %vm634_vm2, %v452_v47  ;;  %v1212_v48 = vpop.eup %1211 }
  0xf8   :  { %v1214_v50 = vpop.eup %1213  ;;  %891 = vst.msk [vmem:[%s2007_s7 + $0xf8] sm:$0xff] %vm859_vm1, %v1212_v48 }
  0xf9   :  { %890 = vst.msk [vmem:[%s2007_s7 + $0xf0] sm:$0xff] %vm859_vm1, %v1214_v50 }

</bundles_post_ra>
